<compile_context>
chip_gen: v5e
topology: v5e:2x2
jax: 0.10.0
libtpu: 0.0.40
codegen_flags: <defaults>
</compile_context>

<pallas_src>
import jax
import jax.numpy as jnp
from jax.experimental import pallas as pl
from jax.experimental.pallas import tpu as pltpu


def _make_dma_concat_kernel(chunk_bounds, P, T):
    """Build a DMA-only concat kernel.

    chunk_bounds: static tuple of (lo, hi) half-open ranges over the class dim.
    Each chunk issues two strided HBM->HBM copies (ctx rows, token rows) into the
    output's two seq offsets; all DMAs are started before any wait.
    """

    def kernel(ctx_hbm, tok_hbm, out_hbm, sem):
        copies = []
        for i, (lo, hi) in enumerate(chunk_bounds):
            c_ctx = pltpu.make_async_copy(
                ctx_hbm.at[lo:hi],              # (hi-lo, P, D) source in HBM
                out_hbm.at[lo:hi, 0:P, :],      # dest seq rows [0, P)
                sem.at[0, i],
            )
            c_tok = pltpu.make_async_copy(
                tok_hbm.at[lo:hi],              # (hi-lo, T, D) source in HBM
                out_hbm.at[lo:hi, P:P + T, :],  # dest seq rows [P, P+T)
                sem.at[1, i],
            )
            c_ctx.start()
            c_tok.start()
            copies.append(c_ctx)
            copies.append(c_tok)
        # All DMAs are in flight before the first wait -> max overlap on the copy engine.
        for c in copies:
            c.wait()

    return kernel


def _plan_chunks(n_cls, out_bytes, *, max_chunks=8, chunk_bytes_target=16 << 20):
    """Split the class dim into a few statically sized chunks (uneven last chunks OK).

    Chunking exists only to keep several DMAs in flight; correctness does not depend on
    it, and any n_cls (prime counts included) is handled without degenerating to
    per-class work.
    """
    assert n_cls >= 1
    want = -(-out_bytes // chunk_bytes_target)           # cdiv: ~chunk_bytes_target each
    n_chunks = int(max(1, min(n_cls, max_chunks, want)))
    if n_cls >= 2:
        n_chunks = max(n_chunks, 2)                      # >=2 DMA pairs in flight
    base, rem = divmod(n_cls, n_chunks)
    bounds, lo = [], 0
    for i in range(n_chunks):
        sz = base + (1 if i < rem else 0)
        bounds.append((lo, lo + sz))
        lo += sz
    return tuple(bounds)


def prompt_learner_forward(ctx_bank: jnp.ndarray, token_bank: jnp.ndarray) -> jnp.ndarray:
    """
    ctx_bank   : (n_cls, P, D) -- learned context vectors per class
    token_bank : (n_cls, T, D) -- frozen token embeddings per class
    returns    : (n_cls, P+T, D)  (same dtype as the inputs; DMA is a byte copy)
    """
    n_cls, P, D = ctx_bank.shape
    n_cls2, T, D2 = token_bank.shape
    assert n_cls == n_cls2 and D == D2
    assert ctx_bank.dtype == token_bank.dtype

    itemsize = ctx_bank.dtype.itemsize
    out_bytes = n_cls * (P + T) * D * itemsize
    bounds = _plan_chunks(n_cls, out_bytes)

    kernel = _make_dma_concat_kernel(bounds, P, T)
    return pl.pallas_call(
        kernel,
        out_shape=jax.ShapeDtypeStruct((n_cls, P + T, D), ctx_bank.dtype),
        in_specs=[
            pl.BlockSpec(memory_space=pl.ANY),   # ctx stays in HBM, no auto-DMA
            pl.BlockSpec(memory_space=pl.ANY),   # tok stays in HBM, no auto-DMA
        ],
        out_specs=pl.BlockSpec(memory_space=pl.ANY),
        scratch_shapes=[pltpu.SemaphoreType.DMA((2, len(bounds)))],
    )(ctx_bank, token_bank)


def build_synthetic_prompt_learner(key, n_cls=4, prompt_len=5, token_seq_len=16,
                                   ctx_dim=128, dtype=jnp.float32):
    """
    Deterministically build the module's state (no checkpoint / tokenizer access):
      - token_bank[cls]   ~ token_embedding(tokenize("a photo of a <cls>")) -> (T, D)
        (synthesized as deterministic random embedding-lookup output)
      - context_bank[cls] = token_bank[cls][5:5+prompt_len]  (use_init_prompt=True path,
        valid because token_seq_len >= 5 + prompt_len)
    Returns (ctx_bank (n_cls,P,D), token_bank (n_cls,T,D)).
    """
    k_tok = jax.random.fold_in(key, 0)
    token_bank = jax.random.normal(k_tok, (n_cls, token_seq_len, ctx_dim), dtype=dtype)
    ctx_bank = token_bank[:, 5:5 + prompt_len, :]
    return ctx_bank, token_bank


if __name__ == "__main__":
    key = jax.random.PRNGKey(0)

    # Small shapes consistent with the module (CLIP-like, scaled down).
    configs = [
        dict(n_cls=4, prompt_len=5, token_seq_len=16, ctx_dim=128),  # even class count
        dict(n_cls=3, prompt_len=5, token_seq_len=16, ctx_dim=128),  # odd -> uneven chunks
    ]
    for cfg in configs:
        ctx_bank, token_bank = build_synthetic_prompt_learner(key, **cfg)
        prompts = jax.block_until_ready(prompt_learner_forward(ctx_bank, token_bank))

        # Reference: plain JAX concat (torch.cat along dim=1 then dim=0 semantics).
        ref = jnp.concatenate([ctx_bank, token_bank], axis=1)
        assert prompts.shape == (
            cfg["n_cls"], cfg["prompt_len"] + cfg["token_seq_len"], cfg["ctx_dim"]
        )
        assert bool(jnp.array_equal(prompts, ref)), "Pallas output mismatch vs reference"

    print("KERNEL_OK")
</pallas_src>

<mosaic_0001>
module attributes {stable_mosaic.version = 11 : i64} {
  func.func @kernel(%arg0: memref<4x5x128xf32, #tpu.memory_space<any>>, %arg1: memref<4x16x128xf32, #tpu.memory_space<any>>, %arg2: memref<4x21x128xf32, #tpu.memory_space<any>>, %arg3: memref<2x2x!tpu.dma_semaphore, #tpu.memory_space<semaphore_mem>>) attributes {dimension_semantics = [], scalar_prefetch = 0 : i64, scratch_operands = 1 : i64, tpu.core_type = #tpu.core_type<tc>} {
    %c0_i32 = arith.constant 0 : i32
    %c0_i32_0 = arith.constant 0 : i32
    %c0_i32_1 = arith.constant 0 : i32
    %c0_i32_2 = arith.constant 0 : i32
    %c0_i32_3 = arith.constant 0 : i32
    %0 = tpu.memref_slice %arg0[%c0_i32_1, %c0_i32_2, %c0_i32_3] : memref<4x5x128xf32, #tpu.memory_space<any>> -> memref<2x5x128xf32, #tpu.memory_space<any>>
    %c0_i32_4 = arith.constant 0 : i32
    %c0_i32_5 = arith.constant 0 : i32
    %c0_i32_6 = arith.constant 0 : i32
    %1 = tpu.memref_slice %arg2[%c0_i32_4, %c0_i32_5, %c0_i32_6] : memref<4x21x128xf32, #tpu.memory_space<any>> -> memref<2x5x128xf32, #tpu.memory_space<any>>
    %2 = tpu.memref_slice %arg3[%c0_i32, %c0_i32_0] : memref<2x2x!tpu.dma_semaphore, #tpu.memory_space<semaphore_mem>> -> memref<1x1x!tpu.dma_semaphore, #tpu.memory_space<semaphore_mem>>
    %3 = tpu.memref_squeeze %2 : memref<1x1x!tpu.dma_semaphore, #tpu.memory_space<semaphore_mem>> -> memref<!tpu.dma_semaphore, #tpu.memory_space<semaphore_mem>>
    tpu.enqueue_dma source(%0 : memref<2x5x128xf32, #tpu.memory_space<any>>) target(%1 : memref<2x5x128xf32, #tpu.memory_space<any>>) target_semaphore(%3 : memref<!tpu.dma_semaphore, #tpu.memory_space<semaphore_mem>>)
    %c1_i32 = arith.constant 1 : i32
    %c0_i32_7 = arith.constant 0 : i32
    %c0_i32_8 = arith.constant 0 : i32
    %c0_i32_9 = arith.constant 0 : i32
    %c0_i32_10 = arith.constant 0 : i32
    %4 = tpu.memref_slice %arg1[%c0_i32_8, %c0_i32_9, %c0_i32_10] : memref<4x16x128xf32, #tpu.memory_space<any>> -> memref<2x16x128xf32, #tpu.memory_space<any>>
    %c0_i32_11 = arith.constant 0 : i32
    %c5_i32 = arith.constant 5 : i32
    %c0_i32_12 = arith.constant 0 : i32
    %5 = tpu.memref_slice %arg2[%c0_i32_11, %c5_i32, %c0_i32_12] : memref<4x21x128xf32, #tpu.memory_space<any>> -> memref<2x16x128xf32, #tpu.memory_space<any>>
    %6 = tpu.memref_slice %arg3[%c1_i32, %c0_i32_7] : memref<2x2x!tpu.dma_semaphore, #tpu.memory_space<semaphore_mem>> -> memref<1x1x!tpu.dma_semaphore, #tpu.memory_space<semaphore_mem>>
    %7 = tpu.memref_squeeze %6 : memref<1x1x!tpu.dma_semaphore, #tpu.memory_space<semaphore_mem>> -> memref<!tpu.dma_semaphore, #tpu.memory_space<semaphore_mem>>
    tpu.enqueue_dma source(%4 : memref<2x16x128xf32, #tpu.memory_space<any>>) target(%5 : memref<2x16x128xf32, #tpu.memory_space<any>>) target_semaphore(%7 : memref<!tpu.dma_semaphore, #tpu.memory_space<semaphore_mem>>)
    %c0_i32_13 = arith.constant 0 : i32
    %c1_i32_14 = arith.constant 1 : i32
    %c2_i32 = arith.constant 2 : i32
    %c0_i32_15 = arith.constant 0 : i32
    %c0_i32_16 = arith.constant 0 : i32
    %8 = tpu.memref_slice %arg0[%c2_i32, %c0_i32_15, %c0_i32_16] : memref<4x5x128xf32, #tpu.memory_space<any>> -> memref<2x5x128xf32, #tpu.memory_space<any>>
    %c2_i32_17 = arith.constant 2 : i32
    %c0_i32_18 = arith.constant 0 : i32
    %c0_i32_19 = arith.constant 0 : i32
    %9 = tpu.memref_slice %arg2[%c2_i32_17, %c0_i32_18, %c0_i32_19] : memref<4x21x128xf32, #tpu.memory_space<any>> -> memref<2x5x128xf32, #tpu.memory_space<any>>
    %10 = tpu.memref_slice %arg3[%c0_i32_13, %c1_i32_14] : memref<2x2x!tpu.dma_semaphore, #tpu.memory_space<semaphore_mem>> -> memref<1x1x!tpu.dma_semaphore, #tpu.memory_space<semaphore_mem>>
    %11 = tpu.memref_squeeze %10 : memref<1x1x!tpu.dma_semaphore, #tpu.memory_space<semaphore_mem>> -> memref<!tpu.dma_semaphore, #tpu.memory_space<semaphore_mem>>
    tpu.enqueue_dma source(%8 : memref<2x5x128xf32, #tpu.memory_space<any>>) target(%9 : memref<2x5x128xf32, #tpu.memory_space<any>>) target_semaphore(%11 : memref<!tpu.dma_semaphore, #tpu.memory_space<semaphore_mem>>)
    %c1_i32_20 = arith.constant 1 : i32
    %c1_i32_21 = arith.constant 1 : i32
    %c2_i32_22 = arith.constant 2 : i32
    %c0_i32_23 = arith.constant 0 : i32
    %c0_i32_24 = arith.constant 0 : i32
    %12 = tpu.memref_slice %arg1[%c2_i32_22, %c0_i32_23, %c0_i32_24] : memref<4x16x128xf32, #tpu.memory_space<any>> -> memref<2x16x128xf32, #tpu.memory_space<any>>
    %c2_i32_25 = arith.constant 2 : i32
    %c5_i32_26 = arith.constant 5 : i32
    %c0_i32_27 = arith.constant 0 : i32
    %13 = tpu.memref_slice %arg2[%c2_i32_25, %c5_i32_26, %c0_i32_27] : memref<4x21x128xf32, #tpu.memory_space<any>> -> memref<2x16x128xf32, #tpu.memory_space<any>>
    %14 = tpu.memref_slice %arg3[%c1_i32_20, %c1_i32_21] : memref<2x2x!tpu.dma_semaphore, #tpu.memory_space<semaphore_mem>> -> memref<1x1x!tpu.dma_semaphore, #tpu.memory_space<semaphore_mem>>
    %15 = tpu.memref_squeeze %14 : memref<1x1x!tpu.dma_semaphore, #tpu.memory_space<semaphore_mem>> -> memref<!tpu.dma_semaphore, #tpu.memory_space<semaphore_mem>>
    tpu.enqueue_dma source(%12 : memref<2x16x128xf32, #tpu.memory_space<any>>) target(%13 : memref<2x16x128xf32, #tpu.memory_space<any>>) target_semaphore(%15 : memref<!tpu.dma_semaphore, #tpu.memory_space<semaphore_mem>>)
    %c0_i32_28 = arith.constant 0 : i32
    %c0_i32_29 = arith.constant 0 : i32
    %c0_i32_30 = arith.constant 0 : i32
    %c0_i32_31 = arith.constant 0 : i32
    %c0_i32_32 = arith.constant 0 : i32
    %16 = tpu.memref_slice %arg0[%c0_i32_30, %c0_i32_31, %c0_i32_32] : memref<4x5x128xf32, #tpu.memory_space<any>> -> memref<2x5x128xf32, #tpu.memory_space<any>>
    %c0_i32_33 = arith.constant 0 : i32
    %c0_i32_34 = arith.constant 0 : i32
    %c0_i32_35 = arith.constant 0 : i32
    %17 = tpu.memref_slice %arg2[%c0_i32_33, %c0_i32_34, %c0_i32_35] : memref<4x21x128xf32, #tpu.memory_space<any>> -> memref<2x5x128xf32, #tpu.memory_space<any>>
    %18 = tpu.memref_slice %arg3[%c0_i32_28, %c0_i32_29] : memref<2x2x!tpu.dma_semaphore, #tpu.memory_space<semaphore_mem>> -> memref<1x1x!tpu.dma_semaphore, #tpu.memory_space<semaphore_mem>>
    %19 = tpu.memref_squeeze %18 : memref<1x1x!tpu.dma_semaphore, #tpu.memory_space<semaphore_mem>> -> memref<!tpu.dma_semaphore, #tpu.memory_space<semaphore_mem>>
    tpu.wait_dma2 semaphore(%19 : memref<!tpu.dma_semaphore, #tpu.memory_space<semaphore_mem>>) src(%16 : memref<2x5x128xf32, #tpu.memory_space<any>>) dst(%17 : memref<2x5x128xf32, #tpu.memory_space<any>>)
    %c1_i32_36 = arith.constant 1 : i32
    %c0_i32_37 = arith.constant 0 : i32
    %c0_i32_38 = arith.constant 0 : i32
    %c0_i32_39 = arith.constant 0 : i32
    %c0_i32_40 = arith.constant 0 : i32
    %20 = tpu.memref_slice %arg1[%c0_i32_38, %c0_i32_39, %c0_i32_40] : memref<4x16x128xf32, #tpu.memory_space<any>> -> memref<2x16x128xf32, #tpu.memory_space<any>>
    %c0_i32_41 = arith.constant 0 : i32
    %c5_i32_42 = arith.constant 5 : i32
    %c0_i32_43 = arith.constant 0 : i32
    %21 = tpu.memref_slice %arg2[%c0_i32_41, %c5_i32_42, %c0_i32_43] : memref<4x21x128xf32, #tpu.memory_space<any>> -> memref<2x16x128xf32, #tpu.memory_space<any>>
    %22 = tpu.memref_slice %arg3[%c1_i32_36, %c0_i32_37] : memref<2x2x!tpu.dma_semaphore, #tpu.memory_space<semaphore_mem>> -> memref<1x1x!tpu.dma_semaphore, #tpu.memory_space<semaphore_mem>>
    %23 = tpu.memref_squeeze %22 : memref<1x1x!tpu.dma_semaphore, #tpu.memory_space<semaphore_mem>> -> memref<!tpu.dma_semaphore, #tpu.memory_space<semaphore_mem>>
    tpu.wait_dma2 semaphore(%23 : memref<!tpu.dma_semaphore, #tpu.memory_space<semaphore_mem>>) src(%20 : memref<2x16x128xf32, #tpu.memory_space<any>>) dst(%21 : memref<2x16x128xf32, #tpu.memory_space<any>>)
    %c0_i32_44 = arith.constant 0 : i32
    %c1_i32_45 = arith.constant 1 : i32
    %c2_i32_46 = arith.constant 2 : i32
    %c0_i32_47 = arith.constant 0 : i32
    %c0_i32_48 = arith.constant 0 : i32
    %24 = tpu.memref_slice %arg0[%c2_i32_46, %c0_i32_47, %c0_i32_48] : memref<4x5x128xf32, #tpu.memory_space<any>> -> memref<2x5x128xf32, #tpu.memory_space<any>>
    %c2_i32_49 = arith.constant 2 : i32
    %c0_i32_50 = arith.constant 0 : i32
    %c0_i32_51 = arith.constant 0 : i32
    %25 = tpu.memref_slice %arg2[%c2_i32_49, %c0_i32_50, %c0_i32_51] : memref<4x21x128xf32, #tpu.memory_space<any>> -> memref<2x5x128xf32, #tpu.memory_space<any>>
    %26 = tpu.memref_slice %arg3[%c0_i32_44, %c1_i32_45] : memref<2x2x!tpu.dma_semaphore, #tpu.memory_space<semaphore_mem>> -> memref<1x1x!tpu.dma_semaphore, #tpu.memory_space<semaphore_mem>>
    %27 = tpu.memref_squeeze %26 : memref<1x1x!tpu.dma_semaphore, #tpu.memory_space<semaphore_mem>> -> memref<!tpu.dma_semaphore, #tpu.memory_space<semaphore_mem>>
    tpu.wait_dma2 semaphore(%27 : memref<!tpu.dma_semaphore, #tpu.memory_space<semaphore_mem>>) src(%24 : memref<2x5x128xf32, #tpu.memory_space<any>>) dst(%25 : memref<2x5x128xf32, #tpu.memory_space<any>>)
    %c1_i32_52 = arith.constant 1 : i32
    %c1_i32_53 = arith.constant 1 : i32
    %c2_i32_54 = arith.constant 2 : i32
    %c0_i32_55 = arith.constant 0 : i32
    %c0_i32_56 = arith.constant 0 : i32
    %28 = tpu.memref_slice %arg1[%c2_i32_54, %c0_i32_55, %c0_i32_56] : memref<4x16x128xf32, #tpu.memory_space<any>> -> memref<2x16x128xf32, #tpu.memory_space<any>>
    %c2_i32_57 = arith.constant 2 : i32
    %c5_i32_58 = arith.constant 5 : i32
    %c0_i32_59 = arith.constant 0 : i32
    %29 = tpu.memref_slice %arg2[%c2_i32_57, %c5_i32_58, %c0_i32_59] : memref<4x21x128xf32, #tpu.memory_space<any>> -> memref<2x16x128xf32, #tpu.memory_space<any>>
    %30 = tpu.memref_slice %arg3[%c1_i32_52, %c1_i32_53] : memref<2x2x!tpu.dma_semaphore, #tpu.memory_space<semaphore_mem>> -> memref<1x1x!tpu.dma_semaphore, #tpu.memory_space<semaphore_mem>>
    %31 = tpu.memref_squeeze %30 : memref<1x1x!tpu.dma_semaphore, #tpu.memory_space<semaphore_mem>> -> memref<!tpu.dma_semaphore, #tpu.memory_space<semaphore_mem>>
    tpu.wait_dma2 semaphore(%31 : memref<!tpu.dma_semaphore, #tpu.memory_space<semaphore_mem>>) src(%28 : memref<2x16x128xf32, #tpu.memory_space<any>>) dst(%29 : memref<2x16x128xf32, #tpu.memory_space<any>>)
    return
  }
}

</mosaic_0001>

<bundles_post_ra>
// kernel: tpu_custom_call.1
= control target key start
LH: loop header
LB: loop body
LE: loop exit
PB: predicated region body
PF: predicated region fallthrough
CT: control target
= control target key end

     0   :  { %s291_s0 = inlined_call_operand.vmem [shape: f32[4,5,128], index: 0, kind: input, shape index: {}]   ;;  %s292_s1 = inlined_call_operand.hbm [shape: f32[4,16,128], index: 1, kind: input, shape index: {}]   ;;  %s293_s2 = inlined_call_operand.vmem [shape: f32[4,21,128], index: 2, kind: output, shape index: {}]  }
   0x1   :  { %v21_v0 = vld [vmem:[%s291_s0] sm:$0x1f]  ;;  %v23_v1 = vld [vmem:[%s291_s0 + $0x8] sm:$0x1f] }
   0x2   :  { %22 = vst [vmem:[%s293_s2] sm:$0x1f] %v21_v0 }
   0x3   :  { %24 = vst [vmem:[%s293_s2 + $0x18] sm:$0x1f] %v23_v1 }
   0x4   :  { %52 = vsyncadd [#allocation2], 160  ;;  %s53_s19 = scalar_lea.vmem %s293_s2, 5  ;;  %s55_s22 = sshll.u32 %s292_s1, 4  ;;  %v170_v2 = vld [vmem:[%s291_s0 + $0x10] sm:$0x1f]  ;;  %s56_s22 = int_to_ptr.hbm [resolvable:$true] %s55_s22 }
   0x5   :  { %s57_s23 = sshll.u32 %s53_s19, 4  ;;  %v172_v3 = vld [vmem:[%s291_s0 + $0x18] sm:$0x1f]  ;;  %s237_s28 = smov 256   ;;  %s58_s23 = int_to_ptr.vmem [resolvable:$true] %s57_s23 }
   0x6   :  { %s238_s29 = smov 384   ;;  %s239_s30 = smov 16  }
   0x7   :  { %62 = dma.hbm_to_vmem [thread:$0]  %s56_s22, 512, %s58_s23, [#allocation2 + $0x2], %s237_s28, %s238_s29, %s239_s30 }
   0x8   :  { %171 = vst [vmem:[%s293_s2 + $0x30] sm:$0x1f] %v170_v2 }
   0x9   :  { %173 = vst [vmem:[%s293_s2 + $0x48] sm:$0x1f] %v172_v3 }
   0xa   :  { %111 = vsyncadd [#allocation2 + $0x1], 160  ;;  %s112_s9 = scalar_lea.hbm %s292_s1, 32  ;;  %s113_s0 = scalar_lea.vmem %s293_s2, 53 }
   0xb   :  { %s115_s12 = sshll.u32 %s112_s9, 4  ;;  %s117_s13 = sshll.u32 %s113_s0, 4  ;;  %s116_s12 = int_to_ptr.hbm [resolvable:$true] %s115_s12  ;;  %s118_s13 = int_to_ptr.vmem [resolvable:$true] %s117_s13 }
   0xc   :  { %122 = dma.hbm_to_vmem [thread:$0]  %s116_s12, 512, %s118_s13, [#allocation2 + $0x3], %s237_s28, %s238_s29, %s239_s30 }
   0xd   :  { %229 = dma.done.wait [#allocation2], 160 }
   0xe   :  { %230 = vsyncadd [#allocation2], 4294967136 }
   0xf   :  { %231 = dma.done.wait [#allocation2 + $0x2], 512 }
  0x10   :  { %232 = vsyncadd [#allocation2 + $0x2], 4294966784 }
  0x11   :  { %233 = dma.done.wait [#allocation2 + $0x1], 160 }
  0x12   :  { %234 = vsyncadd [#allocation2 + $0x1], 4294967136 }
  0x13   :  { %235 = dma.done.wait [#allocation2 + $0x3], 512 }
  0x14   :  { %236 = vsyncadd [#allocation2 + $0x3], 4294966784 }
  0x15   :  { %135 = vsyncmov [#allocation2] }
  0x18   :  { %s136_s14 = vpop.sfrf %135 }
  0x19   :  { %p174_p0 = scmp.ne.s32.totalorder %s136_s14, 0 }
  0x1b   :  { %140 = shalt.err (%p174_p0)  }
  0x1c   :  { %142 = vsyncmov [#allocation2 + $0x1] }
  0x1f   :  { %s143_s1 = vpop.sfrf %142 }
  0x20   :  { %p175_p1 = scmp.ne.s32.totalorder %s143_s1, 0 }
  0x22   :  { %147 = shalt.err (%p175_p1)  }
  0x23   :  { %149 = vsyncmov [#allocation2 + $0x2] }
  0x26   :  { %s150_s2 = vpop.sfrf %149 }
  0x27   :  { %p176_p2 = scmp.ne.s32.totalorder %s150_s2, 0 }
  0x29   :  { %154 = shalt.err (%p176_p2)  }
  0x2a   :  { %156 = vsyncmov [#allocation2 + $0x3] }
  0x2d   :  { %s157_s15 = vpop.sfrf %156 }
  0x2e   :  { %p177_p3 = scmp.ne.s32.totalorder %s157_s15, 0 }
  0x30   :  { %161 = shalt.err (%p177_p3)  }

</bundles_post_ra>
